<compile_context>
chip_gen: v7x
topology: tpu7x:2x2x1
jax: 0.10.0
libtpu: 0.0.40
codegen_flags: <defaults>
</compile_context>

<pallas_src>
import jax
import jax.numpy as jnp
from jax.experimental import pallas as pl
from jax.experimental.pallas import tpu as pltpu


# ------------------------------- fused kernel --------------------------------
def fused_final_layer_kernel(img_ref, ids_ref, len_ref, w_ref, out_ref, acts_ref):
    # img_ref  : (B, C, H*W) f32       ids_ref : (B, S) int32
    # len_ref  : (B, 1) int32
    # w_ref    : (C + V + 1, PAD) bf16 -- stacked along the contraction axis:
    #              rows [0, C)   : w_img * 1/(H*W)      -> output cols [0, D)
    #              rows [C, C+V) : embed_table @ w_txt  -> output cols [D, 2D)
    #              row  C + V    : [b_img | b_txt | 0]  (hit by the constant-1 column)
    # out_ref  : (B, PAD) f32
    # acts_ref : (B, C + V + 1) f32 VMEM scratch -- packed MXU LHS
    f32 = jnp.float32
    B, C, _ = img_ref.shape
    K = w_ref.shape[0]
    V = K - C - 1
    S = ids_ref.shape[1]

    # ---- image head activations: spatial sum (1/(H*W) is folded into w_ref) ----
    acts_ref[:, :C] = jnp.sum(img_ref[...], axis=-1)                 # (B, C) f32

    # ---- text head activations: masked token counts scaled by 1/length ----
    # Refactored as  (counts / len) @ (table @ w_txt):
    #   counts[b, v] = #{ s < len[b] : ids[b, s] == v }
    ids = ids_ref[...]                                               # (B, S) int32
    lengths = len_ref[...]                                           # (B, 1) int32
    pos = jax.lax.broadcasted_iota(jnp.int32, (B, S), 1)             # (B, S)
    masked_ids = jnp.where(pos < lengths, ids, -1)                   # -1 never matches vocab
    vocab = jax.lax.broadcasted_iota(jnp.int32, (B, V), 1)           # (B, V)

    counts = jnp.zeros((B, V), f32)
    for s in range(S):                                               # static unroll, S small (=8)
        counts = counts + (masked_ids[:, s:s + 1] == vocab).astype(f32)

    inv_len = pl.reciprocal(jnp.maximum(lengths.astype(f32), 1.0),
                            approx=True)                             # (B, 1) f32, EUP slot
    acts_ref[:, C:C + V] = counts * inv_len                          # (B, V) f32

    # ---- constant-1 column picks up the bias row of w_ref ----
    acts_ref[:, C + V:] = jnp.ones((B, 1), f32)

    # ---- ONE MXU pass for both heads + bias (K = C+V+1 = 37 << one systolic pass) ----
    out_ref[...] = jnp.dot(acts_ref[...].astype(w_ref.dtype), w_ref[...],
                           preferred_element_type=f32)               # (B, PAD) lane-dense store


# --------------------------- one-time parameter prep --------------------------
def prepare_fused_params(params, spatial_size):
    """Fold the frozen embedding into the txt head, fold 1/(H*W) into the img
    head, stack both heads + bias row into one lane-dense (C+V+1, 128) bf16
    weight (single MXU pass, single weight DMA)."""
    w_img, b_img = params['w_img'], params['b_img']
    w_txt, b_txt = params['w_txt'], params['b_txt']
    table = params['embed_table']

    C, D = w_img.shape
    V = table.shape[0]
    out_pad = ((max(2 * D, 128) + 127) // 128) * 128

    fused_w_txt = jnp.dot(table, w_txt)                              # (V, D), frozen embedding folded in

    w = jnp.zeros((C + V + 1, out_pad), jnp.float32)
    # 1/(H*W) is a power of two here -> lossless under the bf16 cast.
    w = w.at[:C, :D].set(w_img * (1.0 / spatial_size))
    w = w.at[C:C + V, D:2 * D].set(fused_w_txt)
    w = w.at[C + V, :D].set(b_img)                                   # bias row (hit by constant-1 col)
    w = w.at[C + V, D:2 * D].set(b_txt)

    return {'w_all': w.astype(jnp.bfloat16), 'D': D}


# ----------------------------------- wrapper -----------------------------------
def _vmem_spec():
    return pl.BlockSpec(memory_space=pltpu.MemorySpace.VMEM)


def final_layer_forward(x, fused):
    """Mirrors FinalLayer.forward: x = (img, txt, lengths)."""
    img, txt, lengths = x
    B, C, H, W = img.shape
    D = fused['D']
    K, out_pad = fused['w_all'].shape

    img3 = img.reshape(B, C, H * W)                  # spatial axis -> TPU lanes
    len2 = lengths.reshape(B, 1).astype(jnp.int32)
    # TODO(synk): lengths could ride in SMEM / scalar prefetch to shave one tiny DMA.

    out = pl.pallas_call(
        fused_final_layer_kernel,
        out_shape=jax.ShapeDtypeStruct((B, out_pad), jnp.float32),
        in_specs=[_vmem_spec()] * 4,
        out_specs=_vmem_spec(),
        scratch_shapes=[pltpu.VMEM((B, K), jnp.float32)],
        # TODO(synk): if B grows, tile B in multiples of 8 with grid=(B//tb,),
        # dimension_semantics=("parallel",) (v7x: 2 TCs) and weight index_map
        # lambda i: (0, 0) so w_all stays VMEM-resident across grid steps.
        # TODO(synk): if V grows large (v7x 64 MiB VMEM), switch the text head to a
        # gather-accumulate over the fused (V, PAD) table instead of (B, V) counts.
    )(img3, txt, len2, fused['w_all'])

    img_emb = out[:, :D]
    txt_emb = out[:, D:2 * D]
    # torch.squeeze removes all size-1 dims (no-op here: B=2, D=32).
    return jnp.squeeze(img_emb), jnp.squeeze(txt_emb)


# ------------------------------ pure-JAX reference ------------------------------
def reference_forward(x, params):
    img, txt, lengths = x
    B, C, H, W = img.shape
    pooled_img = img.reshape(B, C, H * W).mean(-1)
    ref_img = pooled_img @ params['w_img'] + params['b_img']

    emb = jnp.take(params['embed_table'], txt, axis=0)               # (B, S, E)
    pos = jnp.arange(txt.shape[1])[None, :]
    mask = (pos < lengths[:, None]).astype(jnp.float32)
    denom = jnp.maximum(lengths[:, None].astype(jnp.float32), 1.0)
    pooled_txt = (emb * mask[:, :, None]).sum(1) / denom
    ref_txt = pooled_txt @ params['w_txt'] + params['b_txt']
    return jnp.squeeze(ref_img), jnp.squeeze(ref_txt)


# ------------------------------------ main --------------------------------------
if __name__ == "__main__":
    B, C, H, W = 2, 4, 16, 16   # image batch (NCHW)
    V, S, E, D = 32, 8, 32, 32  # vocab, seq len, embed dim, output dim

    key = jax.random.PRNGKey(0)
    k_img, k_txt, k_tab, k_wi, k_wt = jax.random.split(key, 5)

    img = jax.random.normal(k_img, (B, C, H, W), jnp.float32)
    txt = jax.random.randint(k_txt, (B, S), 0, V, jnp.int32)
    lengths = jnp.array([5, 8], dtype=jnp.int32)

    params = {
        'embed_table': 0.02 * jax.random.normal(k_tab, (V, E), jnp.float32),  # frozen embedding
        'w_img': 0.1 * jax.random.normal(k_wi, (C, D), jnp.float32),
        'b_img': jnp.zeros((D,), jnp.float32),
        'w_txt': 0.1 * jax.random.normal(k_wt, (E, D), jnp.float32),
        'b_txt': jnp.zeros((D,), jnp.float32),
    }

    fused = prepare_fused_params(params, H * W)          # one-time prep (hoisted out of hot path)
    img_out, txt_out = final_layer_forward((img, txt, lengths), fused)
    jax.block_until_ready((img_out, txt_out))

    ref_img, ref_txt = reference_forward((img, txt, lengths), params)

    assert img_out.shape == (B, D) and txt_out.shape == (B, D)
    assert jnp.all(jnp.isfinite(img_out)) and jnp.all(jnp.isfinite(txt_out))
    assert jnp.allclose(img_out, ref_img, rtol=5e-2, atol=5e-3)   # bf16 MXU operands
    assert jnp.allclose(txt_out, ref_txt, rtol=5e-2, atol=5e-3)
    print("KERNEL_OK")
</pallas_src>

<mosaic_0001>
module attributes {stable_mosaic.version = 11 : i64} {
  func.func @fused_final_layer_kernel(%arg0: memref<2x4x256xf32, #tpu.memory_space<vmem>>, %arg1: memref<2x8xi32, #tpu.memory_space<vmem>>, %arg2: memref<2x1xi32, #tpu.memory_space<vmem>>, %arg3: memref<37x128xbf16, #tpu.memory_space<vmem>>, %arg4: memref<2x128xf32, #tpu.memory_space<vmem>>, %arg5: memref<2x37xf32, #tpu.memory_space<vmem>>) attributes {dimension_semantics = [], scalar_prefetch = 0 : i64, scratch_operands = 1 : i64, tpu.core_type = #tpu.core_type<tc>} {
    %c0 = arith.constant 0 : index
    %c0_0 = arith.constant 0 : index
    %c0_1 = arith.constant 0 : index
    %0 = vector.load %arg0[%c0, %c0_0, %c0_1] : memref<2x4x256xf32, #tpu.memory_space<vmem>>, vector<2x4x256xf32>
    %cst = arith.constant dense<0.000000e+00> : vector<2x4xf32>
    %1 = vector.multi_reduction <add>, %0, %cst [2] : vector<2x4x256xf32> to vector<2x4xf32>
    %c0_2 = arith.constant 0 : index
    %c0_3 = arith.constant 0 : index
    %2 = vector.load %arg5[%c0_2, %c0_3] : memref<2x37xf32, #tpu.memory_space<vmem>>, vector<2x4xf32>
    tpu.vector_store %arg5[%c0_2, %c0_3], %1 {strides = array<i32>} : memref<2x37xf32, #tpu.memory_space<vmem>>, vector<2x4xf32>,
    %c0_4 = arith.constant 0 : index
    %c0_5 = arith.constant 0 : index
    %3 = vector.load %arg1[%c0_4, %c0_5] : memref<2x8xi32, #tpu.memory_space<vmem>>, vector<2x8xi32>
    %c0_6 = arith.constant 0 : index
    %c0_7 = arith.constant 0 : index
    %4 = vector.load %arg2[%c0_6, %c0_7] : memref<2x1xi32, #tpu.memory_space<vmem>>, vector<2x1xi32>
    %5 = tpu.iota {dimensions = array<i32: 1>} : vector<2x8xi32>
    %6 = vector.broadcast %4 : vector<2x1xi32> to vector<2x8xi32>
    %7 = arith.cmpi slt, %5, %6 : vector<2x8xi32>
    %c-1_i32 = arith.constant -1 : i32
    %8 = vector.broadcast %c-1_i32 : i32 to vector<2x8xi32>
    %9 = arith.select %7, %3, %8 : vector<2x8xi1>, vector<2x8xi32>
    %10 = tpu.iota {dimensions = array<i32: 1>} : vector<2x32xi32>
    %cst_8 = arith.constant 0.000000e+00 : f32
    %11 = vector.broadcast %cst_8 : f32 to vector<2x32xf32>
    %12 = vector.extract_strided_slice %9 {offsets = [0, 0], sizes = [2, 1], strides = [1, 1]} : vector<2x8xi32> to vector<2x1xi32>
    %13 = vector.broadcast %12 : vector<2x1xi32> to vector<2x32xi32>
    %14 = arith.cmpi eq, %13, %10 : vector<2x32xi32>
    %15 = arith.extui %14 : vector<2x32xi1> to vector<2x32xi32>
    %16 = arith.sitofp %15 : vector<2x32xi32> to vector<2x32xf32>
    %17 = arith.addf %11, %16 : vector<2x32xf32>
    %18 = vector.extract_strided_slice %9 {offsets = [0, 1], sizes = [2, 1], strides = [1, 1]} : vector<2x8xi32> to vector<2x1xi32>
    %19 = vector.broadcast %18 : vector<2x1xi32> to vector<2x32xi32>
    %20 = arith.cmpi eq, %19, %10 : vector<2x32xi32>
    %21 = arith.extui %20 : vector<2x32xi1> to vector<2x32xi32>
    %22 = arith.sitofp %21 : vector<2x32xi32> to vector<2x32xf32>
    %23 = arith.addf %17, %22 : vector<2x32xf32>
    %24 = vector.extract_strided_slice %9 {offsets = [0, 2], sizes = [2, 1], strides = [1, 1]} : vector<2x8xi32> to vector<2x1xi32>
    %25 = vector.broadcast %24 : vector<2x1xi32> to vector<2x32xi32>
    %26 = arith.cmpi eq, %25, %10 : vector<2x32xi32>
    %27 = arith.extui %26 : vector<2x32xi1> to vector<2x32xi32>
    %28 = arith.sitofp %27 : vector<2x32xi32> to vector<2x32xf32>
    %29 = arith.addf %23, %28 : vector<2x32xf32>
    %30 = vector.extract_strided_slice %9 {offsets = [0, 3], sizes = [2, 1], strides = [1, 1]} : vector<2x8xi32> to vector<2x1xi32>
    %31 = vector.broadcast %30 : vector<2x1xi32> to vector<2x32xi32>
    %32 = arith.cmpi eq, %31, %10 : vector<2x32xi32>
    %33 = arith.extui %32 : vector<2x32xi1> to vector<2x32xi32>
    %34 = arith.sitofp %33 : vector<2x32xi32> to vector<2x32xf32>
    %35 = arith.addf %29, %34 : vector<2x32xf32>
    %36 = vector.extract_strided_slice %9 {offsets = [0, 4], sizes = [2, 1], strides = [1, 1]} : vector<2x8xi32> to vector<2x1xi32>
    %37 = vector.broadcast %36 : vector<2x1xi32> to vector<2x32xi32>
    %38 = arith.cmpi eq, %37, %10 : vector<2x32xi32>
    %39 = arith.extui %38 : vector<2x32xi1> to vector<2x32xi32>
    %40 = arith.sitofp %39 : vector<2x32xi32> to vector<2x32xf32>
    %41 = arith.addf %35, %40 : vector<2x32xf32>
    %42 = vector.extract_strided_slice %9 {offsets = [0, 5], sizes = [2, 1], strides = [1, 1]} : vector<2x8xi32> to vector<2x1xi32>
    %43 = vector.broadcast %42 : vector<2x1xi32> to vector<2x32xi32>
    %44 = arith.cmpi eq, %43, %10 : vector<2x32xi32>
    %45 = arith.extui %44 : vector<2x32xi1> to vector<2x32xi32>
    %46 = arith.sitofp %45 : vector<2x32xi32> to vector<2x32xf32>
    %47 = arith.addf %41, %46 : vector<2x32xf32>
    %48 = vector.extract_strided_slice %9 {offsets = [0, 6], sizes = [2, 1], strides = [1, 1]} : vector<2x8xi32> to vector<2x1xi32>
    %49 = vector.broadcast %48 : vector<2x1xi32> to vector<2x32xi32>
    %50 = arith.cmpi eq, %49, %10 : vector<2x32xi32>
    %51 = arith.extui %50 : vector<2x32xi1> to vector<2x32xi32>
    %52 = arith.sitofp %51 : vector<2x32xi32> to vector<2x32xf32>
    %53 = arith.addf %47, %52 : vector<2x32xf32>
    %54 = vector.extract_strided_slice %9 {offsets = [0, 7], sizes = [2, 1], strides = [1, 1]} : vector<2x8xi32> to vector<2x1xi32>
    %55 = vector.broadcast %54 : vector<2x1xi32> to vector<2x32xi32>
    %56 = arith.cmpi eq, %55, %10 : vector<2x32xi32>
    %57 = arith.extui %56 : vector<2x32xi1> to vector<2x32xi32>
    %58 = arith.sitofp %57 : vector<2x32xi32> to vector<2x32xf32>
    %59 = arith.addf %53, %58 : vector<2x32xf32>
    %60 = arith.sitofp %4 : vector<2x1xi32> to vector<2x1xf32>
    %cst_9 = arith.constant 1.000000e+00 : f32
    %61 = vector.broadcast %cst_9 : f32 to vector<2x1xf32>
    %62 = arith.maximumf %60, %61 : vector<2x1xf32>
    %63 = tpu.reciprocal %62 {approx = true} : vector<2x1xf32> -> vector<2x1xf32>
    %64 = vector.broadcast %63 : vector<2x1xf32> to vector<2x32xf32>
    %65 = arith.mulf %59, %64 : vector<2x32xf32>
    %c0_10 = arith.constant 0 : index
    %c4 = arith.constant 4 : index
    %66 = vector.load %arg5[%c0_10, %c4] : memref<2x37xf32, #tpu.memory_space<vmem>>, vector<2x32xf32>
    tpu.vector_store %arg5[%c0_10, %c4], %65 {strides = array<i32>} : memref<2x37xf32, #tpu.memory_space<vmem>>, vector<2x32xf32>,
    %cst_11 = arith.constant 1.000000e+00 : f32
    %67 = vector.broadcast %cst_11 : f32 to vector<2x1xf32>
    %c0_12 = arith.constant 0 : index
    %c36 = arith.constant 36 : index
    %68 = vector.load %arg5[%c0_12, %c36] : memref<2x37xf32, #tpu.memory_space<vmem>>, vector<2x1xf32>
    tpu.vector_store %arg5[%c0_12, %c36], %67 {strides = array<i32>} : memref<2x37xf32, #tpu.memory_space<vmem>>, vector<2x1xf32>,
    %c0_13 = arith.constant 0 : index
    %c0_14 = arith.constant 0 : index
    %69 = vector.load %arg5[%c0_13, %c0_14] : memref<2x37xf32, #tpu.memory_space<vmem>>, vector<2x37xf32>
    %70 = arith.truncf %69 : vector<2x37xf32> to vector<2x37xbf16>
    %c0_15 = arith.constant 0 : index
    %c0_16 = arith.constant 0 : index
    %71 = vector.load %arg3[%c0_15, %c0_16] : memref<37x128xbf16, #tpu.memory_space<vmem>>, vector<37x128xbf16>
    %cst_17 = arith.constant dense<0.000000e+00> : vector<2x128xf32>
    %72 = tpu.matmul %70, %71, %cst_17 {dimension_numbers = #tpu.dot_dimension_numbers<[1], [0], [0], [1], [0, 0, 1, 1], [], []>} : vector<2x37xbf16>, vector<37x128xbf16>, vector<2x128xf32> -> vector<2x128xf32>
    %c0_18 = arith.constant 0 : index
    %c0_19 = arith.constant 0 : index
    %73 = vector.load %arg4[%c0_18, %c0_19] : memref<2x128xf32, #tpu.memory_space<vmem>>, vector<2x128xf32>
    tpu.vector_store %arg4[%c0_18, %c0_19], %72 {strides = array<i32>} : memref<2x128xf32, #tpu.memory_space<vmem>>, vector<2x128xf32>,
    return
  }
}

</mosaic_0001>

<bundles_post_ra>
// kernel: tpu_custom_call.1
= control target key start
LH: loop header
LB: loop body
LE: loop exit
PB: predicated region body
PF: predicated region fallthrough
CT: control target
= control target key end

     0   :  { %9 = vsyncpa [#allocation4], 0  ;;  %s503_s0 = inlined_call_operand.hbm [shape: f32[2,4,256], index: 0, kind: input, shape index: {}]   ;;  %s504_s1 = inlined_call_operand.vmem [shape: s32[2,8], index: 1, kind: input, shape index: {}]   ;;  %s505_s2 = inlined_call_operand.vmem [shape: s32[2,1], index: 2, kind: input, shape index: {}]   ;;  %s506_s3 = inlined_call_operand.hbm [shape: bf16[37,128], index: 3, kind: input, shape index: {}]   ;;  %s507_s4 = inlined_call_operand.hbm [shape: f32[2,128], index: 4, kind: output, shape index: {}]  }
   0x1   :  { %10 = vsyncpa [#allocation7], 0 }
   0x2   :  { %11 = vsyncpa [#allocation5], 0  ;;  %s387_s15 = smov [#allocation3]   ;;  %s315_s19 = scalar_lea.hbm %s503_s0, 256 }
   0x3   :  { %s17_s16 = sshll.u32 %s387_s15, 4  ;;  %p316_p0 = scmp.ne.s32.totalorder %s503_s0, %s315_s19  ;;  %s18_s16 = int_to_ptr.vmem [resolvable:$true] %s17_s16 }
   0x4   :  { %p319_p1 = scmp.lt.u32.totalorder %s315_s19, %s503_s0 }
   0x6   :  { %p321_p2 = pnand %p319_p1, %p316_p0 }
   0x8   :  { %324 = shalt.err (!%p321_p2)
}
   0x9   :  { %s325_s24 = scalar_lea.vmem %s18_s16, 256  ;;  %p330_p4 = scmp.lt.s32.totalorder %s18_s16, %s18_s16 }
   0xa   :  { %p326_p3 = scmp.ne.s32.totalorder %s18_s16, %s325_s24  ;;  %p331_p5 = scmp.lt.s32.totalorder %s325_s24, %s325_s24 }
   0xc   :  { %p332_p6 = por %p331_p5, %p330_p4 }
   0xe   :  { %p333_p7 = pnand %p332_p6, %p326_p3 }
  0x10   :  { %336 = shalt.err (!%p333_p7)
}
  0x11   :  { %s388_s25 = smov 128   ;;  %s389_s26 = smov 8  }
  0x12   :  { %23 = dma.hbm_to_vmem [thread:$0]  %s503_s0, 256, %s18_s16, [#allocation4], %s388_s25, %s388_s25, %s389_s26  }
  0x13   :  { %s390_s29 = smov [#allocation6]   ;;  %s337_s7 = scalar_lea.hbm %s506_s3, 320 }
  0x14   :  { %s33_s30 = sshll.u32 %s390_s29, 4  ;;  %p338_p8 = scmp.ne.s32.totalorder %s506_s3, %s337_s7  ;;  %s34_s30 = int_to_ptr.vmem [resolvable:$true] %s33_s30 }
  0x15   :  { %p341_p9 = scmp.lt.u32.totalorder %s337_s7, %s506_s3 }
  0x17   :  { %p343_p10 = pnand %p341_p9, %p338_p8 }
  0x19   :  { %346 = shalt.err (!%p343_p10)
}
  0x1a   :  { %s347_s12 = scalar_lea.vmem %s34_s30, 320  ;;  %p352_p12 = scmp.lt.s32.totalorder %s34_s30, %s34_s30 }
  0x1b   :  { %p348_p11 = scmp.ne.s32.totalorder %s34_s30, %s347_s12  ;;  %p353_p13 = scmp.lt.s32.totalorder %s347_s12, %s347_s12 }
  0x1d   :  { %p354_p0 = por %p353_p13, %p352_p12 }
  0x1f   :  { %p355_p1 = pnand %p354_p0, %p348_p11 }
  0x21   :  { %358 = shalt.err (!%p355_p1)
}
  0x22   :  { %s391_s0 = smov 64   ;;  %s392_s13 = smov 4  }
  0x23   :  { %39 = dma.hbm_to_vmem [thread:$0]  %s506_s3, 320, %s34_s30, [#allocation7], %s391_s0, %s391_s0, %s392_s13  }
  0x24   :  { %381 = dma.done.wait [#allocation4], 256  }
  0x25   :  { %382 = vsyncadd [#allocation4], 4294967040 }
  0x26   :  { %383 = dma.done.wait [#allocation7], 320  }
  0x27   :  { %384 = vsyncadd [#allocation7], 4294966976  ;;  %v393_v0 = vmov 0   ;;  %v84_v1 = vld [vmem:[%s505_s2] sm:$0x3]  ;;  %v394_v2 = vmov 1   ;;  %v68_v4 = vlaneseq }
  0x28   :  { %298 = vset.pattern.permute.xlu0 %v393_v0  ;;  %299 = vset.pattern.permute.xlu1 %v394_v2  ;;  %v395_v3 = vmov 0.0   ;;  %v83_v6 = vld [vmem:[%s504_s1] sm:$0x3]  ;;  %v146_v9 = vcvt.s32.f32 %v84_v1  ;;  %v396_v10 = vmov 2   ;;  %v397_v11 = vmov 3   ;;  %v47_v18 = vld [vmem:[#allocation3] sm:$0xff] }
  0x29   :  { %86 = vperm.xlu0 %298, %v84_v1   ;;  %269 = vmatprep.subr.bf16.mxu0 %v395_v3  ;;  %v461_v5 = vand.u32 127, %v68_v4  ;;  %v398_v13 = vmov 4   ;;  %v399_v14 = vmov 6   ;;  %v400_v15 = vmov 5   ;;  %v48_v23 = vld [vmem:[#allocation3 + $0x8] sm:$0xff]  ;;  %v310_v42 = vld [vmem:[#allocation6] sm:$0xff]  }
  0x2a   :  { %v147_v12 = vmax.f32 %v146_v9, 1.0  ;;  %v401_v16 = vmov 7   ;;  %v51_v19 = vcombine.high %v47_v18, %v47_v18  ;;  %vm55_vm1 = vcmask 1043456   ;;  %270 = vmatpush3.bf16.msra.mxu0 %v310_v42  ;;  %v311_v45 = vld [vmem:[#allocation6 + $0x8] sm:$0xff]   ;;  %s405_s1 = smov [#allocation8]  }
  0x2b   :  { %v56_v20 = vsel %vm55_vm1, %v47_v18, 0.0  ;;  %v52_v24 = vcombine.high %v48_v23, %v48_v23  ;;  %v61_v25 = vsel %vm55_vm1, %v48_v23, 0.0  ;;  %271 = vmatprep.subr.bf16.mxu0 %v395_v3  ;;  %v312_v46 = vld [vmem:[#allocation6 + $0x10] ss:$0 sps:$4 sm:$0x77]   ;;  %vm189_vm9 = vcmask 1041408  }
  0x2c   :  { %313 = vrcp.f32 %v147_v12  ;;  %v57_v21 = vsel %vm55_vm1, %v51_v19, 0.0  ;;  %vm190_vm10 = vcmask 1042432   ;;  %v402_v49 = vmov 65535   ;;  %s243_s2 = sshll.u32 %s405_s1, 4  ;;  %s244_s2 = int_to_ptr.vmem [resolvable:$true] %s243_s2 }
  0x2d   :  { %v58_v22 = vadd.f32 %v57_v21, %v56_v20  ;;  %v62_v26 = vsel %vm55_vm1, %v52_v24, 0.0  ;;  %v191_v50 = vsel %vm189_vm9, 4294967295, %v402_v49  ;;  %vm403_vm11 = vmmov 0   ;;  %s359_s19 = scalar_lea.vmem %s244_s2, 32  ;;  %p364_p3 = scmp.lt.s32.totalorder %s244_s2, %s244_s2 }
  0x2e   :  { %v63_v27 = vadd.f32 %v62_v26, %v61_v25  ;;  %275 = vmatprep.mubr.msk.bf16.mxu0 %vm403_vm11, %v395_v3  ;;  %272 = vmatpush3.bf16.msra.mxu0 %v311_v45  ;;  %v192_v52 = vsel %vm190_vm10, %v191_v50, 0  ;;  %v71_v60 = vshrl.u32 %v68_v4, 7  ;;  %vm78_vm13 = vcmask 1041409   ;;  %p360_p2 = scmp.ne.s32.totalorder %s244_s2, %s359_s19  ;;  %p365_p4 = scmp.lt.s32.totalorder %s359_s19, %s359_s19 }
  0x2f   :  { %273 = vmatprep.subr.bf16.mxu0 %v395_v3  ;;  %v194_v55 = vand.u32 %v312_v46, %v192_v52  ;;  %vm81_vm14 = vcmask 25600   ;;  %vm159_vm15 = vcmask 287776   ;;  %vm185_vm1 = vcmask 302080  }
  0x30   :  { %v72_v61 = vsub.s32 %v461_v5, %v71_v60  ;;  %p366_p5 = por %p365_p4, %p364_p3 }
  0x32   :  { %274 = vmatpush3.bf16.msra.mxu0 %v194_v55  ;;  %p367_p6 = pnand %p366_p5, %p360_p2 }
  0x36   :  { %v314_v17 = vpop.eup %313 }
  0xa8   :  { %v87_v7 = vpop.permute.xlu0 %86 }
  0xa9   :  { %vm88_vm0 = vcmp.lt.s32.totalorder %v461_v5, %v87_v7 }
  0xaa   :  { %v89_v8 = vsel %vm88_vm0, %v83_v6, 4294967295  ;;  %vm161_vm0 = vcmask 296224   ;;  %v404_v6 = vmov 1.0  }
  0xab   :  { %98 = vperm.xlu1 %299, %v89_v8   ;;  %91 = vperm.xlu0 %298, %v89_v8  }
  0xaf   :  { %300 = vset.pattern.permute.xlu1 %v396_v10  ;;  %301 = vset.pattern.permute.xlu0 %v397_v11 }
  0xb0   :  { %105 = vperm.xlu1 %300, %v89_v8   ;;  %112 = vperm.xlu0 %301, %v89_v8  }
  0xb4   :  { %302 = vset.pattern.permute.xlu1 %v398_v13  ;;  %304 = vset.pattern.permute.xlu0 %v399_v14 }
  0xb5   :  { %119 = vperm.xlu1 %302, %v89_v8   ;;  %133 = vperm.xlu0 %304, %v89_v8  }
  0xb9   :  { %303 = vset.pattern.permute.xlu1 %v400_v15  ;;  %307 = vset.pattern.permute.xlu0 %v393_v0 }
  0xba   :  { %126 = vperm.xlu1 %303, %v89_v8  }
  0xbe   :  { %305 = vset.pattern.permute.xlu1 %v401_v16 }
  0xbf   :  { %140 = vperm.xlu1 %305, %v89_v8  }
  0xc3   :  { %306 = vset.pattern.permute.xlu1 %v393_v0 }
  0xc4   :  { %151 = vperm.xlu1 %306, %v314_v17  }
  0xd4   :  { %59 = vadd.xlane.f32.xlu0 %v58_v22 }
  0xe8   :  { %64 = vadd.xlane.f32.xlu1 %v63_v27 }
 0x12a   :  { %v99_v28 = vpop.permute.xlu1 %98  ;;  %v92_v29 = vpop.permute.xlu0 %91 }
 0x12b   :  { %vm100_vm2 = vcmp.eq.s32.totalorder %v99_v28, %v461_v5  ;;  %vm93_vm3 = vcmp.eq.s32.totalorder %v92_v29, %v461_v5 }
 0x12c   :  { %v254_v30 = vsel %vm100_vm2, 1.0, %v395_v3  ;;  %v253_v31 = vsel %vm93_vm3, 1.0, %v395_v3 }
 0x12d   :  { %v103_v34 = vadd.f32 %v254_v30, %v253_v31 }
 0x12f   :  { %v106_v32 = vpop.permute.xlu1 %105  ;;  %v113_v33 = vpop.permute.xlu0 %112 }
 0x130   :  { %vm107_vm4 = vcmp.eq.s32.totalorder %v106_v32, %v461_v5  ;;  %vm114_vm5 = vcmp.eq.s32.totalorder %v113_v33, %v461_v5 }
 0x131   :  { %v255_v35 = vsel %vm107_vm4, 1.0, %v395_v3  ;;  %v256_v38 = vsel %vm114_vm5, 1.0, %v395_v3 }
 0x132   :  { %v110_v36 = vadd.f32 %v255_v35, %v103_v34 }
 0x134   :  { %v120_v37 = vpop.permute.xlu1 %119  ;;  %v117_v39 = vadd.f32 %v256_v38, %v110_v36  ;;  %v134_v40 = vpop.permute.xlu0 %133 }
 0x135   :  { %vm121_vm6 = vcmp.eq.s32.totalorder %v120_v37, %v461_v5  ;;  %vm135_vm7 = vcmp.eq.s32.totalorder %v134_v40, %v461_v5 }
 0x136   :  { %v257_v41 = vsel %vm121_vm6, 1.0, %v395_v3  ;;  %v259_v51 = vsel %vm135_vm7, 1.0, %v395_v3 }
 0x137   :  { %v124_v44 = vadd.f32 %v257_v41, %v117_v39 }
 0x139   :  { %v127_v43 = vpop.permute.xlu1 %126 }
 0x13a   :  { %vm128_vm8 = vcmp.eq.s32.totalorder %v127_v43, %v461_v5 }
 0x13b   :  { %v258_v47 = vsel %vm128_vm8, 1.0, %v395_v3 }
 0x13c   :  { %v131_v48 = vadd.f32 %v258_v47, %v124_v44 }
 0x13e   :  { %v141_v53 = vpop.permute.xlu1 %140  ;;  %v138_v54 = vadd.f32 %v259_v51, %v131_v48 }
 0x13f   :  { %vm142_vm12 = vcmp.eq.s32.totalorder %v141_v53, %v461_v5 }
 0x140   :  { %v260_v56 = vsel %vm142_vm12, 1.0, %v395_v3 }
 0x141   :  { %v145_v57 = vadd.f32 %v260_v56, %v138_v54 }
 0x143   :  { %v152_v58 = vpop.permute.xlu1 %151 }
 0x144   :  { %v154_v59 = vmul.f32 %v152_v58, %v145_v57 }
 0x146   :  { %156 = vrot.lane.b32.xlu0 %v154_v59, %s392_s13 }
 0x161   :  { %v60_v62 = vpop.xlane.xlu0 %59 }
 0x162   :  { %v73_v63 = vrot.slane %v60_v62, %v72_v61 }
 0x175   :  { %v65_v0 = vpop.xlane.xlu1 %64 }
 0x176   :  { %v77_v1 = vrot.slane %v65_v0, %v72_v61 }
 0x178   :  { %v79_v2 = vsel %vm78_vm13, %v77_v1, %v73_v63 }
 0x179   :  { %82 = vst.msk [vmem:[#allocation2] sm:$0x3] %vm81_vm14, %v79_v2 }
 0x1b8   :  { %v157_v3 = vpop.permute.xlu0 %156 }
 0x1b9   :  { %160 = vst.msk [vmem:[#allocation2] sm:$0x3] %vm159_vm15, %v157_v3 }
 0x1ba   :  { %162 = vst.msk [vmem:[#allocation2] sm:$0x3] %vm161_vm0, %v404_v6 }
 0x1c1   :  { %v163_v7 = vld [vmem:[#allocation2] sm:$0x3] }
 0x1c2   :  { %v164_v8 = vpack.c.bf16 %v163_v7, %v163_v7 }
 0x1c4   :  { %276 = vmatmul.mubr.msk.bf16.vlgmr.msra.gmra.mrb[0].mxu0 %vm185_vm1, %v164_v8 }
 0x297   :  { %v230_v4 = vpop.f32.mrb[0].mxu0 }
 0x298   :  { %236 = vst [vmem:[#allocation8] sm:$0x3] %v230_v4  ;;  %v277_v5 = vpop.f32.mrb[1].mxu0 }
 0x299   :  { %v233_v9 = vpop.f32.mrb[2].mxu0 }
 0x29a   :  { %370 = shalt.err (!%p367_p6)
}
 0x29b   :  { %s371_s22 = scalar_lea.hbm %s507_s4, 32 }
 0x29c   :  { %p372_p7 = scmp.ne.s32.totalorder %s507_s4, %s371_s22  ;;  %p375_p8 = scmp.lt.u32.totalorder %s371_s22, %s507_s4 }
 0x29e   :  { %p377_p9 = pnand %p375_p8, %p372_p7 }
 0x2a0   :  { %380 = shalt.err (!%p377_p9)
}
 0x2a1   :  { %246 = dma.vmem_to_hbm [thread:$0]  %s244_s2, 32, %s507_s4, [#allocation5]   ;;  %v278_v10 = vpop.f32.mrb[3].mxu0 }
 0x2a2   :  { %385 = dma.done.wait [#allocation5], 32  }
 0x2a3   :  { %386 = vsyncadd [#allocation5], 4294967264 }
 0x2a4   :  { %250 = vsyncpa [#allocation4], 1 }
 0x2a5   :  { %251 = vsyncpa [#allocation7], 1 }
 0x2a6   :  { %252 = vsyncpa [#allocation5], 1 }

</bundles_post_ra>
